<compile_context>
chip_gen: v6e
topology: v6e:2x2x1
jax: 0.10.0
libtpu: 0.0.40
codegen_flags: <defaults>
</compile_context>

<pallas_src>
import jax
import jax.numpy as jnp
from jax import lax
from jax.experimental import pallas as pl
from jax.experimental.pallas import tpu as pltpu


def _round_up(x, m):
    return (x + m - 1) // m * m


def _vmem_budget_bytes():
    """Generation-aware VMEM budget (leave ~25% headroom for the compiler)."""
    cap = None
    try:
        info = pltpu.get_tpu_info()
        for name in ("vmem_capacity_bytes", "vmem_size_bytes"):
            cap = getattr(info, name, None)
            if cap:
                break
    except Exception:
        cap = None
    if not cap:
        cap = 64 << 20  # conservative fallback: v7x per-TensorCore VMEM
    return int(cap) * 3 // 4


def _pick_vocab_tile(v_pad, tv_req):
    """Largest multiple-of-128 tile <= tv_req that divides v_pad (lane-dense stores)."""
    tv_req = max(128, _round_up(int(tv_req), 128))
    tv = min(tv_req, v_pad)
    while tv > 128 and v_pad % tv != 0:
        tv -= 128
    return tv


def _linear_kernel(x_ref, w_ref, b_ref, o_ref):
    # One (tm, tv) logits tile:  x_tile[tm, D] . W_tile[tv, D]^T + bias_tile.
    # Contract dim 1 of both operands -> weight stays in native [V, D] layout.
    acc = lax.dot_general(
        x_ref[...], w_ref[...],
        dimension_numbers=(((1,), (1,)), ((), ())),
        preferred_element_type=jnp.float32)
    o_ref[...] = (acc + b_ref[...]).astype(o_ref.dtype)


def _linear_kernel_ktiled(x_ref, w_ref, b_ref, o_ref, acc_ref):
    # K-tiled variant: accumulate partial products over the d_model grid axis.
    k = pl.program_id(2)

    @pl.when(k == 0)
    def _():
        acc_ref[...] = jnp.zeros_like(acc_ref)

    acc_ref[...] += lax.dot_general(
        x_ref[...], w_ref[...],
        dimension_numbers=(((1,), (1,)), ((), ())),
        preferred_element_type=jnp.float32)

    @pl.when(k == pl.num_programs(2) - 1)
    def _():
        o_ref[...] = (acc_ref[...] + b_ref[...]).astype(o_ref.dtype)


def linear_sequence_decoder_pallas(
    prev_tokens,                    # [..., d_model]  (e.g. [B, L, d_model])
    weight,                         # [n_vocab, d_model]  (native torch nn.Linear layout)
    bias,                           # [n_vocab]
    prev_token_padding_mask=None,   # unused by the reference forward
    memory=None,                    # unused
    memory_padding_mask=None,       # unused
    *,
    tm=1024,                        # row tile (rounded to the sublane packing of compute_dtype)
    tv=512,                         # vocab tile (multiple of 128; lane-dense stores)
    tk=1024,                        # max d_model tile (K tiling only if it divides d_model)
    compute_dtype=jnp.bfloat16,     # MXU input dtype; accumulation is always f32
    out_dtype=None,                 # logits dtype; default = prev_tokens.dtype
):
    del prev_token_padding_mask, memory, memory_padding_mask  # ignored (spec)

    lead_shape = prev_tokens.shape[:-1]
    d_model = prev_tokens.shape[-1]
    n_vocab, d_w = weight.shape
    assert d_w == d_model, (weight.shape, d_model)
    assert bias.shape == (n_vocab,), bias.shape

    compute_dtype = jnp.dtype(compute_dtype)
    out_dtype = jnp.dtype(out_dtype) if out_dtype is not None else prev_tokens.dtype
    in_bytes = compute_dtype.itemsize
    out_bytes = jnp.dtype(out_dtype).itemsize

    # ---- activations: single cast + (possibly no-op) pad -------------------
    x = prev_tokens.reshape(-1, d_model)
    if x.dtype != compute_dtype:
        x = x.astype(compute_dtype)
    n_rows = x.shape[0]

    # ---- tile sizes (dtype-aware sublane rounding) --------------------------
    sub = max(8, 32 // in_bytes)            # 8 for f32, 16 for bf16, 32 for int8/fp8
    tm = max(sub, min(_round_up(int(tm), sub), _round_up(n_rows, sub)))
    v_pad = _round_up(n_vocab, 128)
    tv = _pick_vocab_tile(v_pad, tv)

    # K (d_model) tiling only when it divides evenly; otherwise full-depth panels.
    tk = max(128, _round_up(int(tk), 128))
    tk_eff = tk if (d_model > tk and d_model % tk == 0) else d_model
    k_tiles = d_model // tk_eff

    # ---- fit double-buffered tiles into the per-generation VMEM budget ------
    budget = _vmem_budget_bytes()

    def _usage(tm_, tv_):
        u = 2 * (tm_ * tk_eff + tv_ * tk_eff) * in_bytes   # x / W tiles (double-buffered)
        u += 2 * tm_ * tv_ * out_bytes                     # output tiles
        u += 2 * tv_ * 4                                   # bias tiles
        if k_tiles > 1:
            u += tm_ * tv_ * 4                             # f32 accumulator scratch
        return u + (2 << 20)                               # slack for compiler internals

    while _usage(tm, tv) > budget and (tm > sub or tv > 128):
        if tm >= tv and tm > sub:
            tm = max(sub, _round_up(tm // 2, sub))
        elif tv > 128:
            tv = _pick_vocab_tile(v_pad, tv // 2)
        else:
            break

    n_pad = _round_up(n_rows, tm)
    m_tiles = n_pad // tm
    v_tiles = v_pad // tv

    # ---- pads / casts are no-ops when params are already aligned + pre-cast --
    if n_pad != n_rows:
        x = jnp.pad(x, ((0, n_pad - n_rows), (0, 0)))

    w = weight if weight.dtype == compute_dtype else weight.astype(compute_dtype)
    if v_pad != n_vocab:
        w = jnp.pad(w, ((0, v_pad - n_vocab), (0, 0)))      # native [V, D]; no transpose

    b = bias if bias.dtype == jnp.float32 else bias.astype(jnp.float32)
    if v_pad != n_vocab:
        b = jnp.pad(b, (0, v_pad - n_vocab))
    b = b.reshape(1, v_pad)

    # Decode-like shapes (single row tile): lead with the vocab axis so the
    # megacore split has a >1-sized leading parallel axis (v7x has 2 TCs).
    vocab_major = (m_tiles == 1 and v_tiles > 1)

    if k_tiles > 1:
        if vocab_major:
            grid = (v_tiles, m_tiles, k_tiles)
            x_map = lambda j, i, k: (i, k)
            w_map = lambda j, i, k: (j, k)
            b_map = lambda j, i, k: (0, j)
            o_map = lambda j, i, k: (i, j)
        else:
            grid = (m_tiles, v_tiles, k_tiles)
            x_map = lambda i, j, k: (i, k)
            w_map = lambda i, j, k: (j, k)
            b_map = lambda i, j, k: (0, j)
            o_map = lambda i, j, k: (i, j)
        kernel = _linear_kernel_ktiled
        scratch = [pltpu.VMEM((tm, tv), jnp.float32)]
        sem = ("parallel", "parallel", "arbitrary")
    else:
        if vocab_major:
            grid = (v_tiles, m_tiles)
            x_map = lambda j, i: (i, 0)
            w_map = lambda j, i: (j, 0)
            b_map = lambda j, i: (0, j)
            o_map = lambda j, i: (i, j)
        else:
            grid = (m_tiles, v_tiles)
            x_map = lambda i, j: (i, 0)
            w_map = lambda i, j: (j, 0)
            b_map = lambda i, j: (0, j)
            o_map = lambda i, j: (i, j)
        kernel = _linear_kernel
        scratch = []
        sem = ("parallel", "parallel")

    flops = 2 * n_rows * d_model * n_vocab
    bytes_accessed = ((n_pad + v_pad) * d_model * in_bytes
                      + n_pad * v_pad * out_bytes + v_pad * 4)

    out = pl.pallas_call(
        kernel,
        out_shape=jax.ShapeDtypeStruct((n_pad, v_pad), out_dtype),
        grid_spec=pltpu.PrefetchScalarGridSpec(
            num_scalar_prefetch=0,
            grid=grid,
            in_specs=[
                pl.BlockSpec((tm, tk_eff), x_map),    # activations [N, D]
                pl.BlockSpec((tv, tk_eff), w_map),    # weight, native [V, D] layout
                pl.BlockSpec((1, tv), b_map),         # bias [1, Vp]
            ],
            out_specs=pl.BlockSpec((tm, tv), o_map),
            scratch_shapes=scratch,
        ),
        compiler_params=pltpu.CompilerParams(
            dimension_semantics=sem,
            vmem_limit_bytes=int(budget),             # ~96 MiB on v5e/v6e, ~48 MiB on v7x
        ),
        cost_estimate=pl.CostEstimate(
            flops=flops, transcendentals=0, bytes_accessed=bytes_accessed),
    )(x, w, b)

    logits = out[:n_rows, :n_vocab]
    return logits.reshape(*lead_shape, n_vocab)


def linear_sequence_decoder_reference(prev_tokens, weight, bias):
    """Plain-JAX reference: logits = prev_tokens @ W.T + b (torch nn.Linear)."""
    return (jnp.dot(prev_tokens.astype(jnp.float32), weight.astype(jnp.float32).T,
                    precision=lax.Precision.HIGHEST)
            + bias.astype(jnp.float32))


if __name__ == "__main__":
    key = jax.random.PRNGKey(0)

    # ---- Test 1: small shapes, exact f32 data path --------------------------
    B, L, D_MODEL, N_VOCAB = 2, 8, 32, 33
    k_x, k_w, k_b, k_m, key = jax.random.split(key, 5)
    prev_tokens = jax.random.normal(k_x, (B, L, D_MODEL), jnp.float32)
    prev_token_padding_mask = jax.random.uniform(k_m, (B, L)) > 0.8  # ignored by forward
    limit = (6.0 / (D_MODEL + N_VOCAB)) ** 0.5
    weight = jax.random.uniform(k_w, (N_VOCAB, D_MODEL), jnp.float32, -limit, limit)
    bias = jax.random.uniform(k_b, (N_VOCAB,), jnp.float32, -0.1, 0.1)

    ref = linear_sequence_decoder_reference(prev_tokens, weight, bias)

    out_f32 = jax.block_until_ready(
        linear_sequence_decoder_pallas(
            prev_tokens, weight, bias,
            prev_token_padding_mask=prev_token_padding_mask,
            compute_dtype=jnp.float32))
    assert out_f32.shape == (B, L, N_VOCAB), out_f32.shape
    err = float(jnp.max(jnp.abs(out_f32 - ref)))
    assert jnp.allclose(out_f32, ref, atol=1e-3, rtol=1e-3), f"f32 max abs err = {err}"

    # ---- Test 2: default bf16 data path (f32 accumulation) ------------------
    out_bf = jax.block_until_ready(
        linear_sequence_decoder_pallas(
            prev_tokens, weight, bias,
            prev_token_padding_mask=prev_token_padding_mask))
    err = float(jnp.max(jnp.abs(out_bf - ref)))
    assert jnp.allclose(out_bf, ref, atol=5e-2, rtol=5e-2), f"bf16 max abs err = {err}"

    # ---- Test 3: exercise K tiling + vocab-major (decode-like) grid ---------
    B3, L3, D3, V3 = 1, 4, 256, 200
    k_x, k_w, k_b, key = jax.random.split(key, 4)
    x3 = jax.random.normal(k_x, (B3, L3, D3), jnp.float32)
    limit3 = (6.0 / (D3 + V3)) ** 0.5
    w3 = jax.random.uniform(k_w, (V3, D3), jnp.float32, -limit3, limit3)
    b3 = jax.random.uniform(k_b, (V3,), jnp.float32, -0.1, 0.1)
    out3 = jax.block_until_ready(
        linear_sequence_decoder_pallas(x3, w3, b3, tv=128, tk=128))
    ref3 = linear_sequence_decoder_reference(x3, w3, b3)
    assert out3.shape == (B3, L3, V3), out3.shape
    err = float(jnp.max(jnp.abs(out3 - ref3)))
    assert jnp.allclose(out3, ref3, atol=5e-2, rtol=5e-2), f"ktiled max abs err = {err}"

    print("KERNEL_OK")
</pallas_src>

<mosaic_0001>
module attributes {stable_mosaic.version = 11 : i64} {
  func.func @_linear_kernel(%arg0: i32, %arg1: i32, %arg2: memref<16x32xf32, #tpu.memory_space<vmem>>, %arg3: memref<128x32xf32, #tpu.memory_space<vmem>>, %arg4: memref<1x128xf32, #tpu.memory_space<vmem>>, %arg5: memref<16x128xf32, #tpu.memory_space<vmem>>) attributes {dimension_semantics = [#tpu.dimension_semantics<parallel>, #tpu.dimension_semantics<parallel>], iteration_bounds = array<i64: 1, 1>, scalar_prefetch = 0 : i64, scratch_operands = 0 : i64, tpu.core_type = #tpu.core_type<tc>, window_params = [{transform_indices = @transform_0, window_bounds = array<i64: 16, 32>}, {transform_indices = @transform_1, window_bounds = array<i64: 128, 32>}, {transform_indices = @transform_2, window_bounds = array<i64: 1, 128>}, {transform_indices = @transform_3, window_bounds = array<i64: 16, 128>}]} {
    %c0 = arith.constant 0 : index
    %c0_0 = arith.constant 0 : index
    %0 = vector.load %arg2[%c0, %c0_0] : memref<16x32xf32, #tpu.memory_space<vmem>>, vector<16x32xf32>
    %c0_1 = arith.constant 0 : index
    %c0_2 = arith.constant 0 : index
    %1 = vector.load %arg3[%c0_1, %c0_2] : memref<128x32xf32, #tpu.memory_space<vmem>>, vector<128x32xf32>
    %cst = arith.constant dense<0.000000e+00> : vector<16x128xf32>
    %2 = tpu.matmul %0, %1, %cst {dimension_numbers = #tpu.dot_dimension_numbers<[1], [1], [0], [0], [0, 0, 1, 0], [], []>} : vector<16x32xf32>, vector<128x32xf32>, vector<16x128xf32> -> vector<16x128xf32>
    %c0_3 = arith.constant 0 : index
    %c0_4 = arith.constant 0 : index
    %3 = vector.load %arg4[%c0_3, %c0_4] : memref<1x128xf32, #tpu.memory_space<vmem>>, vector<1x128xf32>
    %4 = vector.broadcast %3 : vector<1x128xf32> to vector<16x128xf32>
    %5 = arith.addf %2, %4 : vector<16x128xf32>
    %c0_5 = arith.constant 0 : index
    %c0_6 = arith.constant 0 : index
    %6 = vector.load %arg5[%c0_5, %c0_6] : memref<16x128xf32, #tpu.memory_space<vmem>>, vector<16x128xf32>
    tpu.vector_store %arg5[%c0_5, %c0_6], %5 {strides = array<i32>} : memref<16x128xf32, #tpu.memory_space<vmem>>, vector<16x128xf32>,
    return
  }
  func.func @transform_0(%arg0: i32, %arg1: i32) -> (i32, i32) {
    %c0_i32 = arith.constant 0 : i32
    %c0_i32_0 = arith.constant 0 : i32
    return %arg0, %c0_i32 : i32, i32
  }
  func.func @transform_1(%arg0: i32, %arg1: i32) -> (i32, i32) {
    %c0_i32 = arith.constant 0 : i32
    %c0_i32_0 = arith.constant 0 : i32
    return %arg1, %c0_i32 : i32, i32
  }
  func.func @transform_2(%arg0: i32, %arg1: i32) -> (i32, i32) {
    %c0_i32 = arith.constant 0 : i32
    %c0_i32_0 = arith.constant 0 : i32
    return %c0_i32, %arg1 : i32, i32
  }
  func.func @transform_3(%arg0: i32, %arg1: i32) -> (i32, i32) {
    %c0_i32 = arith.constant 0 : i32
    return %arg0, %arg1 : i32, i32
  }
}

</mosaic_0001>

<bundles_post_ra>
// kernel: tpu_custom_call.1
= control target key start
LH: loop header
LB: loop body
LE: loop exit
PB: predicated region body
PF: predicated region fallthrough
CT: control target
= control target key end

     0   :  { %vm40_vm0 = vcmask 261120   ;;  %s402_s0 = inlined_call_operand.vmem [shape: f32[16,32], index: 0, kind: input, shape index: {}]   ;;  %s403_s1 = inlined_call_operand.vmem [shape: f32[128,32], index: 1, kind: input, shape index: {}]   ;;  %s404_s2 = inlined_call_operand.vmem [shape: f32[1,128], index: 2, kind: input, shape index: {}]   ;;  %s405_s3 = inlined_call_operand.hbm [shape: f32[16,128], index: 3, kind: output, shape index: {}]  }
   0x1   :  { %v32_v0 = vld [vmem:[%s403_s1 + $0x78] sm:$0xff]  ;;  %v31_v1 = vld [vmem:[%s403_s1 + $0x70] sm:$0xff]  ;;  %v30_v2 = vld [vmem:[%s403_s1 + $0x68] sm:$0xff] }
   0x2   :  { %225 = vmatprep.subr.msk.mxu0 %vm40_vm0, %v32_v0  ;;  %v15_v3 = vld [vmem:[%s402_s0] sm:$0xff] }
   0x3   :  { %226 = vmatpush3.xpose.msk.msra.mxu0 %vm40_vm0, %v32_v0  ;;  %257 = vmatprep.mubr.msk.f32.mxu0 %vm40_vm0, %v15_v3 }
   0x4   :  { %227 = vmatprep.subr.msk.mxu0 %vm40_vm0, %v31_v1 }
   0x7   :  { %228 = vmatpush3.xpose.msk.msra.mxu0 %vm40_vm0, %v31_v1 }
   0x8   :  { %8 = vsyncpa [#allocation3], 0  ;;  %229 = vmatprep.subr.msk.mxu0 %vm40_vm0, %v30_v2  ;;  %v29_v4 = vld [vmem:[%s403_s1 + $0x60] sm:$0xff]  ;;  %v28_v5 = vld [vmem:[%s403_s1 + $0x58] sm:$0xff]  ;;  %s285_s23 = smov [#allocation2]  }
   0x9   :  { %v27_v6 = vld [vmem:[%s403_s1 + $0x50] sm:$0xff]  ;;  %v26_v7 = vld [vmem:[%s403_s1 + $0x48] sm:$0xff]  ;;  %v25_v8 = vld [vmem:[%s403_s1 + $0x40] sm:$0xff]  ;;  %s177_s24 = sshll.u32 %s285_s23, 4  ;;  %s178_s24 = int_to_ptr.vmem [resolvable:$true] %s177_s24 }
   0xa   :  { %v24_v9 = vld [vmem:[%s403_s1 + $0x38] sm:$0xff]  ;;  %v23_v10 = vld [vmem:[%s403_s1 + $0x30] sm:$0xff]  ;;  %v22_v11 = vld [vmem:[%s403_s1 + $0x28] sm:$0xff]  ;;  %p268_p1 = scmp.lt.s32.totalorder %s178_s24, %s178_s24 }
   0xb   :  { %230 = vmatpush3.xpose.msk.msra.mxu0 %vm40_vm0, %v30_v2  ;;  %v21_v12 = vld [vmem:[%s403_s1 + $0x20] sm:$0xff]  ;;  %v20_v13 = vld [vmem:[%s403_s1 + $0x18] sm:$0xff]  ;;  %v19_v14 = vld [vmem:[%s403_s1 + $0x10] sm:$0xff] }
   0xc   :  { %231 = vmatprep.subr.msk.mxu0 %vm40_vm0, %v29_v4  ;;  %v18_v15 = vld [vmem:[%s403_s1 + $0x8] sm:$0xff]  ;;  %v17_v16 = vld [vmem:[%s403_s1] sm:$0xff]  ;;  %s263_s1 = scalar_lea.vmem %s178_s24, 256 }
   0xd   :  { %v16_v17 = vld [vmem:[%s402_s0 + $0x8] sm:$0xff]  ;;  %v188_v18 = vld [vmem:[%s404_s2] ss:$0 sm:$0xff]  ;;  %p264_p0 = scmp.ne.s32.totalorder %s178_s24, %s263_s1  ;;  %p269_p2 = scmp.lt.s32.totalorder %s263_s1, %s263_s1 }
   0xf   :  { %232 = vmatpush3.xpose.msk.msra.mxu0 %vm40_vm0, %v29_v4  ;;  %p270_p3 = por %p269_p2, %p268_p1 }
  0x10   :  { %233 = vmatprep.subr.msk.mxu0 %vm40_vm0, %v28_v5 }
  0x11   :  { %p271_p4 = pnand %p270_p3, %p264_p0 }
  0x13   :  { %234 = vmatpush3.xpose.msk.msra.mxu0 %vm40_vm0, %v28_v5 }
  0x14   :  { %235 = vmatprep.subr.msk.mxu0 %vm40_vm0, %v27_v6 }
  0x17   :  { %236 = vmatpush3.xpose.msk.msra.mxu0 %vm40_vm0, %v27_v6 }
  0x18   :  { %237 = vmatprep.subr.msk.mxu0 %vm40_vm0, %v26_v7 }
  0x1b   :  { %238 = vmatpush3.xpose.msk.msra.mxu0 %vm40_vm0, %v26_v7 }
  0x1c   :  { %239 = vmatprep.subr.msk.mxu0 %vm40_vm0, %v25_v8 }
  0x1f   :  { %240 = vmatpush3.xpose.msk.msra.mxu0 %vm40_vm0, %v25_v8 }
  0x20   :  { %241 = vmatprep.subr.msk.mxu0 %vm40_vm0, %v24_v9 }
  0x23   :  { %242 = vmatpush3.xpose.msk.msra.mxu0 %vm40_vm0, %v24_v9 }
  0x24   :  { %243 = vmatprep.subr.msk.mxu0 %vm40_vm0, %v23_v10 }
  0x27   :  { %244 = vmatpush3.xpose.msk.msra.mxu0 %vm40_vm0, %v23_v10 }
  0x28   :  { %245 = vmatprep.subr.msk.mxu0 %vm40_vm0, %v22_v11 }
  0x2b   :  { %246 = vmatpush3.xpose.msk.msra.mxu0 %vm40_vm0, %v22_v11 }
  0x2c   :  { %247 = vmatprep.subr.msk.mxu0 %vm40_vm0, %v21_v12 }
  0x2f   :  { %248 = vmatpush3.xpose.msk.msra.mxu0 %vm40_vm0, %v21_v12 }
  0x30   :  { %249 = vmatprep.subr.msk.mxu0 %vm40_vm0, %v20_v13 }
  0x33   :  { %250 = vmatpush3.xpose.msk.msra.mxu0 %vm40_vm0, %v20_v13 }
  0x34   :  { %251 = vmatprep.subr.msk.mxu0 %vm40_vm0, %v19_v14 }
  0x37   :  { %252 = vmatpush3.xpose.msk.msra.mxu0 %vm40_vm0, %v19_v14 }
  0x38   :  { %253 = vmatprep.subr.msk.mxu0 %vm40_vm0, %v18_v15 }
  0x3b   :  { %254 = vmatpush3.xpose.msk.msra.mxu0 %vm40_vm0, %v18_v15 }
  0x3c   :  { %255 = vmatprep.subr.msk.mxu0 %vm40_vm0, %v17_v16 }
  0x3f   :  { %256 = vmatpush3.xpose.msk.msra.mxu0 %vm40_vm0, %v17_v16 }
  0x42   :  { %258 = vmatmul.mubr.msk.f32.vlgmr.msra.gmra.mxu0 %vm40_vm0, %v16_v17 }
 0x102   :  { %v259_v19 = vpop.f32.mrf.mxu0 }
 0x103   :  { %v167_v20 = vadd.f32 %v259_v19, %v188_v18 }
 0x104   :  { %v161_v21 = vpop.f32.mrf.mxu0 }
 0x105   :  { %171 = vst [vmem:[#allocation2 + $0x8] sm:$0xff] %v167_v20  ;;  %v162_v22 = vadd.f32 %v188_v18, %v161_v21 }
 0x107   :  { %170 = vst [vmem:[#allocation2] sm:$0xff] %v162_v22 }
 0x108   :  { %274 = shalt.err (!%p271_p4)
}
 0x109   :  { %s286_s0 = smov 128   ;;  %s287_s25 = smov 8  }
 0x10a   :  { %183 = dma.vmem_to_hbm [thread:$0]  %s178_s24, 256, %s405_s3, [#allocation3], %s286_s0, %s286_s0, %s287_s25  }
 0x10b   :  { %283 = dma.done.wait [#allocation3], 256  }
 0x10c   :  { %284 = vsyncadd [#allocation3], 4294967040 }
 0x10d   :  { %187 = vsyncpa [#allocation3], 1 }

</bundles_post_ra>
